<compile_context>
chip_gen: v5e
topology: v5e:2x2
jax: 0.10.0
libtpu: 0.0.40
codegen_flags: <defaults>
</compile_context>

<pallas_src>
import jax
import jax.numpy as jnp
from jax.experimental import pallas as pl
from jax.experimental.pallas import tpu as pltpu


def _diffusion_embedding_kernel(noise_ref, exp_ref, phase_ref,
                                w1_ref, b1_ref, w2_ref, b2_ref, out_ref):
    # Embedding: sin(noise * [e|e] + [0|pi/2]) == [sin(noise*e) | cos(noise*e)]
    # One EUP sin pass over (TB, n_channels); no lane concat.  The constant
    # pos_emb_scale is pre-folded into exp_ref at init time.
    sc = jnp.sin(noise_ref[...] * exp_ref[...] + phase_ref[...])      # (TB, n_ch)

    # projection1 + SiLU (single K=n_channels MXU push).  Sigmoid keeps the
    # standard lowering; EUP has slack after the single-sin change -- re-derive
    # the binding slot before switching to pl.reciprocal(approx=True).
    h = jnp.dot(sc, w1_ref[...], preferred_element_type=jnp.float32) + b1_ref[...]
    h = h * jax.nn.sigmoid(h)

    # projection2 + SiLU.
    h2 = jnp.dot(h, w2_ref[...], preferred_element_type=jnp.float32) + b2_ref[...]
    out_ref[...] = h2 * jax.nn.sigmoid(h2)


def _select_batch_tile(B, block_b, out_dim, vmem_budget_bytes):
    """Largest legal batch tile: divides B, is a multiple of 8 (or == B), and
    its double-buffered input/output blocks fit the VMEM budget."""
    def fits(tb):
        # double-buffered per-step blocks: noise (tb,1) in + (tb,out) out, f32
        return 2 * 4 * tb * (out_dim + 1) <= vmem_budget_bytes

    if (block_b is not None and 0 < block_b <= B and B % block_b == 0
            and (block_b == B or block_b % 8 == 0) and fits(block_b)):
        return block_b
    divisors = sorted((d for d in range(1, B + 1) if B % d == 0), reverse=True)
    for tb in divisors:                       # largest valid divisor that fits
        if (tb == B or tb % 8 == 0) and fits(tb):
            return tb
    for tb in divisors:                       # last resort: legal shape only
        if tb == B or tb % 8 == 0:
            return tb
    return B


def diffusion_embedding(noise_level, exp_dup, phase, w1, b1, w2, b2, *,
                        block_b=None, split_threshold=2048,
                        vmem_budget_bytes=8 << 20):
    """noise_level: (B, 1) f32.
    exp_dup: (n_channels,) = scale * [e, e] with e = 1e-4**(arange(half)/half).
    phase:   (n_channels,) = [0]*half + [pi/2]*half.
    w1: (n_channels, out); b1: (out,); w2: (out, out); b2: (out,).
    Weights are (in, out) -- transposed from the PyTorch nn.Linear convention
    -- so the kernel computes x @ W + b directly on the MXU.
    Returns (B, out) float32."""
    B = noise_level.shape[0]
    n_channels = exp_dup.shape[-1]
    out_dim = w1.shape[1]
    assert w1.shape == (n_channels, out_dim) and w2.shape == (out_dim, out_dim)
    assert phase.shape[-1] == n_channels

    if block_b is None:
        # grid=(1,) by default (single-TC v5e/v6e and small batches); only
        # split 2-way for v7x's dual TensorCore when per-TC work exceeds the
        # per-step pipeline overhead.
        if B >= split_threshold and B % 16 == 0:
            block_b = B // 2
        else:
            block_b = B
    tb = _select_batch_tile(B, block_b, out_dim, vmem_budget_bytes)
    grid = (B // tb,)

    # Advisory cost hint: the whole call is ~MFLOPs / ~100s of KiB, so wall
    # time is launch/scheduling dominated -- help XLA overlap around it.
    flops = 2 * B * (n_channels * out_dim + out_dim * out_dim) + 6 * B * out_dim
    transcendentals = B * (n_channels + 2 * out_dim)        # sin + two sigmoids
    bytes_accessed = 4 * (B + 2 * n_channels
                          + (n_channels + 1) * out_dim
                          + (out_dim + 1) * out_dim
                          + B * out_dim)

    return pl.pallas_call(
        _diffusion_embedding_kernel,
        out_shape=jax.ShapeDtypeStruct((B, out_dim), jnp.float32),
        grid=grid,
        in_specs=[
            pl.BlockSpec((tb, 1), lambda i: (i, 0)),                  # noise tile
            pl.BlockSpec((1, n_channels), lambda i: (0, 0)),          # exp_dup
            pl.BlockSpec((1, n_channels), lambda i: (0, 0)),          # phase
            pl.BlockSpec((n_channels, out_dim), lambda i: (0, 0)),    # w1
            pl.BlockSpec((1, out_dim), lambda i: (0, 0)),             # b1
            pl.BlockSpec((out_dim, out_dim), lambda i: (0, 0)),       # w2
            pl.BlockSpec((1, out_dim), lambda i: (0, 0)),             # b2
        ],
        out_specs=pl.BlockSpec((tb, out_dim), lambda i: (i, 0)),
        compiler_params=pltpu.CompilerParams(
            dimension_semantics=("parallel",),      # lets v7x TCs split the grid
            vmem_limit_bytes=vmem_budget_bytes,     # same budget as tile search
        ),
        cost_estimate=pl.CostEstimate(flops=flops,
                                      transcendentals=transcendentals,
                                      bytes_accessed=bytes_accessed),
    )(noise_level,
      exp_dup.reshape(1, n_channels), phase.reshape(1, n_channels),
      w1, b1.reshape(1, out_dim), w2, b2.reshape(1, out_dim))


def reference(noise_level, exponents, w1, b1, w2, b2, *, scale):
    x = scale * noise_level * exponents[None, :]
    x = jnp.concatenate([jnp.sin(x), jnp.cos(x)], axis=-1)
    x = x @ w1 + b1
    x = x * jax.nn.sigmoid(x)
    x = x @ w2 + b2
    x = x * jax.nn.sigmoid(x)
    return x


if __name__ == "__main__":
    # Hyperparameters implied by the module:
    #   hparam.ddpm.pos_emb_channels = 32  -> half_dim = 16
    #   hparam.ddpm.pos_emb_scale    = 1000.0
    #   hparam.arch.pos_emb_dim      = 64
    n_channels = 32
    half_dim = n_channels // 2
    out_channels = 64
    scale = 1000.0
    batch = 16            # small example batch; grid collapses to (1,)

    key = jax.random.PRNGKey(0)
    k_noise, k_w1, k_b1, k_w2, k_b2 = jax.random.split(key, 5)

    # Buffer: exponents = 0.0001 ** (arange(half_dim) / half_dim)
    exponents = jnp.power(
        jnp.float32(1e-4),
        jnp.arange(half_dim, dtype=jnp.float32) / jnp.float32(half_dim))
    scaled = jnp.float32(scale) * exponents                 # scale folded in
    exp_dup = jnp.concatenate([scaled, scaled])             # (n_channels,)
    phase = jnp.concatenate([jnp.zeros((half_dim,), jnp.float32),
                             jnp.full((half_dim,), jnp.pi / 2, jnp.float32)])

    # Deterministic "Linear" parameter init (uniform, like torch default
    # bounds).  Weights are (in_features, out_features); w1's first half_dim
    # rows multiply sin(x), the second half_dim rows multiply cos(x), matching
    # the reference concat order [sin, cos].
    bound1 = 1.0 / (n_channels ** 0.5)
    bound2 = 1.0 / (out_channels ** 0.5)
    w1 = jax.random.uniform(k_w1, (n_channels, out_channels),
                            jnp.float32, -bound1, bound1)
    b1 = jax.random.uniform(k_b1, (out_channels,), jnp.float32, -bound1, bound1)
    w2 = jax.random.uniform(k_w2, (out_channels, out_channels),
                            jnp.float32, -bound2, bound2)
    b2 = jax.random.uniform(k_b2, (out_channels,), jnp.float32, -bound2, bound2)

    # noise_level in (0, 1), shape (B, 1)
    noise_level = jax.random.uniform(k_noise, (batch, 1), jnp.float32, 0.0, 1.0)

    out = diffusion_embedding(noise_level, exp_dup, phase, w1, b1, w2, b2)
    out = jax.block_until_ready(out)

    ref = reference(noise_level, exponents, w1, b1, w2, b2, scale=scale)
    assert out.shape == (batch, out_channels)
    # scale=1000 pushes |x|~1000 into sin; f32 range reduction plus the +pi/2
    # phase substitution (cos(x) == sin(x + pi/2)) costs a few 1e-4 of slack
    # vs. the XLA sin/cos reference.
    assert jnp.allclose(out, ref, atol=2e-3, rtol=2e-3), "mismatch vs reference"

    print("KERNEL_OK")
</pallas_src>

<mosaic_0001>
module attributes {stable_mosaic.version = 11 : i64} {
  func.func @_diffusion_embedding_kernel(%arg0: i32, %arg1: memref<16x1xf32, #tpu.memory_space<vmem>>, %arg2: memref<1x32xf32, #tpu.memory_space<vmem>>, %arg3: memref<1x32xf32, #tpu.memory_space<vmem>>, %arg4: memref<32x64xf32, #tpu.memory_space<vmem>>, %arg5: memref<1x64xf32, #tpu.memory_space<vmem>>, %arg6: memref<64x64xf32, #tpu.memory_space<vmem>>, %arg7: memref<1x64xf32, #tpu.memory_space<vmem>>, %arg8: memref<16x64xf32, #tpu.memory_space<vmem>>) attributes {dimension_semantics = [#tpu.dimension_semantics<parallel>], iteration_bounds = array<i64: 1>, scalar_prefetch = 0 : i64, scratch_operands = 0 : i64, tpu.core_type = #tpu.core_type<tc>, window_params = [{transform_indices = @transform_0, window_bounds = array<i64: 16, 1>}, {pipeline_mode = #tpu.pipeline_mode<synchronous>, transform_indices = @transform_1, window_bounds = array<i64: 1, 32>}, {pipeline_mode = #tpu.pipeline_mode<synchronous>, transform_indices = @transform_2, window_bounds = array<i64: 1, 32>}, {pipeline_mode = #tpu.pipeline_mode<synchronous>, transform_indices = @transform_3, window_bounds = array<i64: 32, 64>}, {pipeline_mode = #tpu.pipeline_mode<synchronous>, transform_indices = @transform_4, window_bounds = array<i64: 1, 64>}, {pipeline_mode = #tpu.pipeline_mode<synchronous>, transform_indices = @transform_5, window_bounds = array<i64: 64, 64>}, {pipeline_mode = #tpu.pipeline_mode<synchronous>, transform_indices = @transform_6, window_bounds = array<i64: 1, 64>}, {transform_indices = @transform_7, window_bounds = array<i64: 16, 64>}]} {
    %c0 = arith.constant 0 : index
    %c0_0 = arith.constant 0 : index
    %0 = vector.load %arg1[%c0, %c0_0] : memref<16x1xf32, #tpu.memory_space<vmem>>, vector<16x1xf32>
    %c0_1 = arith.constant 0 : index
    %c0_2 = arith.constant 0 : index
    %1 = vector.load %arg2[%c0_1, %c0_2] : memref<1x32xf32, #tpu.memory_space<vmem>>, vector<1x32xf32>
    %2 = vector.broadcast %0 : vector<16x1xf32> to vector<16x32xf32>
    %3 = vector.broadcast %1 : vector<1x32xf32> to vector<16x32xf32>
    %4 = arith.mulf %2, %3 : vector<16x32xf32>
    %c0_3 = arith.constant 0 : index
    %c0_4 = arith.constant 0 : index
    %5 = vector.load %arg3[%c0_3, %c0_4] : memref<1x32xf32, #tpu.memory_space<vmem>>, vector<1x32xf32>
    %6 = vector.broadcast %5 : vector<1x32xf32> to vector<16x32xf32>
    %7 = arith.addf %4, %6 : vector<16x32xf32>
    %8 = math.sin %7 : vector<16x32xf32>
    %c0_5 = arith.constant 0 : index
    %c0_6 = arith.constant 0 : index
    %9 = vector.load %arg4[%c0_5, %c0_6] : memref<32x64xf32, #tpu.memory_space<vmem>>, vector<32x64xf32>
    %cst = arith.constant dense<0.000000e+00> : vector<16x64xf32>
    %10 = tpu.matmul %8, %9, %cst {dimension_numbers = #tpu.dot_dimension_numbers<[1], [0], [0], [1], [0, 0, 1, 1], [], []>} : vector<16x32xf32>, vector<32x64xf32>, vector<16x64xf32> -> vector<16x64xf32>
    %c0_7 = arith.constant 0 : index
    %c0_8 = arith.constant 0 : index
    %11 = vector.load %arg5[%c0_7, %c0_8] : memref<1x64xf32, #tpu.memory_space<vmem>>, vector<1x64xf32>
    %12 = vector.broadcast %11 : vector<1x64xf32> to vector<16x64xf32>
    %13 = arith.addf %10, %12 : vector<16x64xf32>
    %14 = arith.negf %13 : vector<16x64xf32>
    %15 = math.exp %14 : vector<16x64xf32>
    %cst_9 = arith.constant 1.000000e+00 : f32
    %16 = vector.broadcast %cst_9 : f32 to vector<16x64xf32>
    %17 = arith.addf %16, %15 : vector<16x64xf32>
    %18 = arith.divf %16, %17 : vector<16x64xf32>
    %19 = arith.mulf %13, %18 : vector<16x64xf32>
    %c0_10 = arith.constant 0 : index
    %c0_11 = arith.constant 0 : index
    %20 = vector.load %arg6[%c0_10, %c0_11] : memref<64x64xf32, #tpu.memory_space<vmem>>, vector<64x64xf32>
    %cst_12 = arith.constant dense<0.000000e+00> : vector<16x64xf32>
    %21 = tpu.matmul %19, %20, %cst_12 {dimension_numbers = #tpu.dot_dimension_numbers<[1], [0], [0], [1], [0, 0, 1, 1], [], []>} : vector<16x64xf32>, vector<64x64xf32>, vector<16x64xf32> -> vector<16x64xf32>
    %c0_13 = arith.constant 0 : index
    %c0_14 = arith.constant 0 : index
    %22 = vector.load %arg7[%c0_13, %c0_14] : memref<1x64xf32, #tpu.memory_space<vmem>>, vector<1x64xf32>
    %23 = vector.broadcast %22 : vector<1x64xf32> to vector<16x64xf32>
    %24 = arith.addf %21, %23 : vector<16x64xf32>
    %25 = arith.negf %24 : vector<16x64xf32>
    %26 = math.exp %25 : vector<16x64xf32>
    %cst_15 = arith.constant 1.000000e+00 : f32
    %27 = vector.broadcast %cst_15 : f32 to vector<16x64xf32>
    %28 = arith.addf %27, %26 : vector<16x64xf32>
    %29 = arith.divf %27, %28 : vector<16x64xf32>
    %30 = arith.mulf %24, %29 : vector<16x64xf32>
    %c0_16 = arith.constant 0 : index
    %c0_17 = arith.constant 0 : index
    %31 = vector.load %arg8[%c0_16, %c0_17] : memref<16x64xf32, #tpu.memory_space<vmem>>, vector<16x64xf32>
    tpu.vector_store %arg8[%c0_16, %c0_17], %30 {strides = array<i32>} : memref<16x64xf32, #tpu.memory_space<vmem>>, vector<16x64xf32>,
    return
  }
  func.func @transform_0(%arg0: i32) -> (i32, i32) {
    %c0_i32 = arith.constant 0 : i32
    %c0_i32_0 = arith.constant 0 : i32
    return %arg0, %c0_i32 : i32, i32
  }
  func.func @transform_1(%arg0: i32) -> (i32, i32) {
    %c0_i32 = arith.constant 0 : i32
    %c0_i32_0 = arith.constant 0 : i32
    %c0_i32_1 = arith.constant 0 : i32
    return %c0_i32, %c0_i32_0 : i32, i32
  }
  func.func @transform_2(%arg0: i32) -> (i32, i32) {
    %c0_i32 = arith.constant 0 : i32
    %c0_i32_0 = arith.constant 0 : i32
    %c0_i32_1 = arith.constant 0 : i32
    return %c0_i32, %c0_i32_0 : i32, i32
  }
  func.func @transform_3(%arg0: i32) -> (i32, i32) {
    %c0_i32 = arith.constant 0 : i32
    %c0_i32_0 = arith.constant 0 : i32
    %c0_i32_1 = arith.constant 0 : i32
    return %c0_i32, %c0_i32_0 : i32, i32
  }
  func.func @transform_4(%arg0: i32) -> (i32, i32) {
    %c0_i32 = arith.constant 0 : i32
    %c0_i32_0 = arith.constant 0 : i32
    %c0_i32_1 = arith.constant 0 : i32
    return %c0_i32, %c0_i32_0 : i32, i32
  }
  func.func @transform_5(%arg0: i32) -> (i32, i32) {
    %c0_i32 = arith.constant 0 : i32
    %c0_i32_0 = arith.constant 0 : i32
    %c0_i32_1 = arith.constant 0 : i32
    return %c0_i32, %c0_i32_0 : i32, i32
  }
  func.func @transform_6(%arg0: i32) -> (i32, i32) {
    %c0_i32 = arith.constant 0 : i32
    %c0_i32_0 = arith.constant 0 : i32
    %c0_i32_1 = arith.constant 0 : i32
    return %c0_i32, %c0_i32_0 : i32, i32
  }
  func.func @transform_7(%arg0: i32) -> (i32, i32) {
    %c0_i32 = arith.constant 0 : i32
    %c0_i32_0 = arith.constant 0 : i32
    return %arg0, %c0_i32 : i32, i32
  }
}

</mosaic_0001>

<bundles_post_ra>
// kernel: tpu_custom_call.1
= control target key start
LH: loop header
LB: loop body
LE: loop exit
PB: predicated region body
PF: predicated region fallthrough
CT: control target
= control target key end

     0   :  { %12 = vsyncpa [#allocation3], 0  ;;  %s980_s0 = inlined_call_operand.vmem [shape: f32[16,1], index: 0, kind: input, shape index: {}]   ;;  %s981_s1 = inlined_call_operand.vmem [shape: f32[1,32], index: 1, kind: input, shape index: {}]   ;;  %s982_s2 = inlined_call_operand.vmem [shape: f32[1,32], index: 2, kind: input, shape index: {}]   ;;  %s983_s3 = inlined_call_operand.hbm [shape: f32[32,64], index: 3, kind: input, shape index: {}]   ;;  %s984_s4 = inlined_call_operand.vmem [shape: f32[1,64], index: 4, kind: input, shape index: {}]   ;;  %s985_s5 = inlined_call_operand.hbm [shape: f32[64,64], index: 5, kind: input, shape index: {}]   ;;  %s986_s6 = inlined_call_operand.vmem [shape: f32[1,64], index: 6, kind: input, shape index: {}]   ;;  %s987_s7 = inlined_call_operand.hbm [shape: f32[16,64], index: 7, kind: output, shape index: {}]  }
   0x1   :  { %13 = vsyncpa [#allocation6], 0 }
   0x2   :  { %14 = vsyncpa [#allocation4], 0  ;;  %s25_s26 = sshll.u32 %s983_s3, 4  ;;  %s712_s27 = smov [#allocation2]   ;;  %s26_s26 = int_to_ptr.hbm [resolvable:$true] %s25_s26 }
   0x3   :  { %s27_s28 = sshll.u32 %s712_s27, 4  ;;  %s40_s8 = sshll.u32 %s985_s5, 4  ;;  %s28_s28 = int_to_ptr.vmem [resolvable:$true] %s27_s28  ;;  %s41_s8 = int_to_ptr.hbm [resolvable:$true] %s40_s8 }
   0x4   :  { %s713_s9 = smov 128   ;;  %s714_s10 = smov 8  }
   0x5   :  { %33 = dma.hbm_to_vmem [thread:$0]  %s26_s26, 512, %s28_s28, [#allocation3], %s713_s9, %s713_s9, %s714_s10  }
   0x6   :  { %s715_s11 = smov [#allocation5]  }
   0x7   :  { %s42_s12 = sshll.u32 %s715_s11, 4  ;;  %s43_s12 = int_to_ptr.vmem [resolvable:$true] %s42_s12 }
   0x8   :  { %48 = dma.hbm_to_vmem [thread:$0]  %s41_s8, 1024, %s43_s12, [#allocation6], %s713_s9, %s713_s9, %s714_s10  }
   0x9   :  { %706 = dma.done.wait [#allocation3], 512  }
   0xa   :  { %707 = vsyncadd [#allocation3], 4294966784 }
   0xb   :  { %708 = dma.done.wait [#allocation6], 1024  }
   0xc   :  { %709 = vsyncadd [#allocation6], 4294966272  ;;  %v716_v0 = vmov 0   ;;  %v60_v1 = vld [vmem:[%s980_s0 + $0x8] sm:$0xff]  ;;  %v59_v2 = vld [vmem:[%s980_s0] sm:$0xff]  ;;  %s561_s22 = sshll.u32 %s987_s7, 4  ;;  %s562_s22 = int_to_ptr.hbm [resolvable:$true] %s561_s22 }
   0xd   :  { %613 = vset.pattern.permute.xlu0 %v716_v0  ;;  %v614_v3 = vld [vmem:[%s981_s1] ss:$0 sm:$0xff]  ;;  %v396_v6 = vld [vmem:[#allocation2 + $0x18] sm:$0xff]  ;;  %v395_v7 = vld [vmem:[#allocation2 + $0x10] sm:$0xff]  ;;  %v717_v31 = vmov 2102212464  }
   0xe   :  { %69 = vperm.xlu0 %613, %v60_v1   ;;  %v615_v4 = vld [vmem:[%s982_s2] ss:$0 sm:$0xff]  ;;  %589 = vmatpush.msra.mxu3 %v396_v6  ;;  %v394_v9 = vld [vmem:[#allocation2 + $0x8] sm:$0xff]  ;;  %v718_v33 = vmov 920167782  }
   0xf   :  { %420 = vmatpush.msra.mxu0 %v396_v6  ;;  %v393_v11 = vld [vmem:[#allocation2] sm:$0xff]  ;;  %v719_v36 = vmov 683565275   ;;  %v720_v39 = vmov 1326507024  }
  0x10   :  { %590 = vmatpush.msra.mxu3 %v395_v7  ;;  %v721_v41 = vmov 2475754826   ;;  %v722_v45 = vmov 2131351028  }
  0x11   :  { %421 = vmatpush.msra.mxu0 %v395_v7 }
  0x12   :  { %591 = vmatpush.msra.mxu3 %v394_v9 }
  0x13   :  { %422 = vmatpush.msra.mxu0 %v394_v9 }
  0x14   :  { %592 = vmatpush.msra.mxu3 %v393_v11 }
  0x15   :  { %423 = vmatpush.msra.mxu0 %v393_v11 }
  0x16   :  { %64 = vperm.xlu0 %613, %v59_v2  }
  0x80   :  { %v70_v5 = vpop.permute.xlu0 %69 }
  0x81   :  { %v76_v8 = vmul.f32 %v614_v3, %v70_v5 }
  0x83   :  { %v789_v10 = vadd.f32 %v615_v4, %v76_v8 }
  0x85   :  { %v241_v12 = vand.u32 2139095040, %v789_v10  ;;  %v238_v13 = vand.u32 2147483647, %v789_v10 }
  0x87   :  { %v242_v14 = vshrl.u32 %v241_v12, 23  ;;  %v245_v15 = vand.u32 8388607, %v238_v13 }
  0x88   :  { %v65_v16 = vpop.permute.xlu0 %64 }
  0x89   :  { %v578_v17 = vadd.s32 4294967169, %v242_v14  ;;  %v75_v18 = vmul.f32 %v614_v3, %v65_v16  ;;  %v246_v19 = vor.u32 8388608, %v245_v15 }
  0x8b   :  { %v248_v20 = vadd.s32 1, %v578_v17  ;;  %v795_v21 = vadd.f32 %v615_v4, %v75_v18  ;;  %v798_v23 = vshll.u32 %v246_v19, 8 }
  0x8d   :  { %vm249_vm0 = vcmp.gt.s32.totalorder %v248_v20, 0  ;;  %v86_v22 = vand.u32 2139095040, %v795_v21  ;;  %v803_v29 = vand.u32 65535, %v798_v23  ;;  %v83_v30 = vand.u32 2147483647, %v795_v21 }
  0x8e   :  { %v250_v24 = vsel %vm249_vm0, %v248_v20, 0  ;;  %v288_v15 = vshrl.u32 %v798_v23, 16 }
  0x8f   :  { %v252_v25 = vand.u32 31, %v250_v24  ;;  %v87_v26 = vshrl.u32 %v86_v22, 23  ;;  %v800_v27 = vshrl.u32 %v250_v24, 5  ;;  %v821_v1 = vand.u32 8388607, %v83_v30 }
  0x91   :  { %v253_v28 = vsub.s32 32, %v252_v25  ;;  %v264_v32 = vshll.u32 %v717_v31, %v252_v25  ;;  %v267_v34 = vshll.u32 %v718_v33, %v252_v25  ;;  %v575_v35 = vadd.s32 4294967169, %v87_v26 }
  0x92   :  { %v255_v37 = vshll.u32 %v719_v36, %v252_v25  ;;  %v258_v43 = vshll.u32 %v721_v41, %v252_v25  ;;  %v261_v47 = vshll.u32 %v722_v45, %v252_v25  ;;  %vm273_vm1 = vcmp.lt.s32.totalorder %v800_v27, 4 }
  0x93   :  { %v265_v38 = vshrl.u32 %v718_v33, %v253_v28  ;;  %v268_v40 = vshrl.u32 %v720_v39, %v253_v28  ;;  %v256_v42 = vshrl.u32 %v721_v41, %v253_v28  ;;  %v93_v44 = vadd.s32 1, %v575_v35 }
  0x94   :  { %v259_v46 = vshrl.u32 %v722_v45, %v253_v28  ;;  %v262_v48 = vshrl.u32 %v717_v31, %v253_v28  ;;  %v254_v52 = vshrl.u32 %v719_v36, %v253_v28  ;;  %vm270_vm3 = vcmp.lt.s32.totalorder %v800_v27, 1 }
  0x95   :  { %v266_v49 = vor.u32 %v265_v38, %v264_v32  ;;  %v269_v50 = vor.u32 %v268_v40, %v267_v34  ;;  %v257_v51 = vor.u32 %v256_v42, %v255_v37  ;;  %vm94_vm2 = vcmp.gt.s32.totalorder %v93_v44, 0 }
  0x96   :  { %v260_v53 = vor.u32 %v259_v46, %v258_v43  ;;  %v263_v54 = vor.u32 %v262_v48, %v261_v47  ;;  %v95_v57 = vsel %vm94_vm2, %v93_v44, 0  ;;  %vm272_vm4 = vcmp.lt.s32.totalorder %v800_v27, 3 }
  0x97   :  { %v279_v55 = vsel %vm273_vm1, %v266_v49, 920167782  ;;  %v283_v56 = vsel %vm273_vm1, %v269_v50, 1326507024  ;;  %v816_v58 = vand.u32 31, %v95_v57  ;;  %v823_v2 = vshrl.u32 %v95_v57, 5 }
  0x98   :  { %v275_v59 = vsel %vm273_vm1, %v263_v54, 2102212464  ;;  %v278_v60 = vsel %vm270_vm3, %v257_v51, %v260_v53  ;;  %v280_v61 = vsel %vm272_vm4, %v263_v54, %v279_v55  ;;  %v282_v62 = vsel %vm270_vm3, %v260_v53, %v263_v54 }
  0x99   :  { %v284_v63 = vsel %vm272_vm4, %v266_v49, %v283_v56  ;;  %v826_v3 = vsub.s32 32, %v816_v58  ;;  %vm271_vm5 = vcmp.lt.s32.totalorder %v800_v27, 2  ;;  %v274_v4 = vsel %vm270_vm3, %v254_v52, %v257_v51 }
  0x9a   :  { %v112_v5 = vshll.u32 %v718_v33, %v816_v58  ;;  %v276_v6 = vsel %vm272_vm4, %v260_v53, %v275_v59  ;;  %v281_v7 = vsel %vm271_vm5, %v278_v60, %v280_v61  ;;  %v285_v8 = vsel %vm271_vm5, %v282_v62, %v284_v63 }
  0x9b   :  { %v110_v9 = vshrl.u32 %v718_v33, %v826_v3  ;;  %v113_v11 = vshrl.u32 %v720_v39, %v826_v3  ;;  %v289_v12 = vand.u32 65535, %v285_v8  ;;  %v290_v14 = vshrl.u32 %v285_v8, 16 }
  0x9c   :  { %v311_v16 = vand.u32 65535, %v281_v7  ;;  %v312_v17 = vshrl.u32 %v281_v7, 16  ;;  %v109_v18 = vshll.u32 %v717_v31, %v816_v58  ;;  %vm118_vm6 = vcmp.lt.s32.totalorder %v823_v2, 4 }
  0x9d   :  { %v114_v19 = vor.u32 %v113_v11, %v112_v5  ;;  %v292_v20 = vmul.u32 %v290_v14, %v803_v29  ;;  %v843_v22 = vsel %vm271_vm5, %v274_v4, %v276_v6  ;;  %v293_v24 = vmul.u32 %v289_v12, %v288_v15 }
  0x9e   :  { %v314_v25 = vmul.u32 %v312_v17, %v803_v29  ;;  %v91_v26 = vor.u32 8388608, %v821_v1  ;;  %v111_v28 = vor.u32 %v110_v9, %v109_v18  ;;  %v291_v32 = vmul.u32 %v289_v12, %v803_v29 }
  0x9f   :  { %v294_v33 = vmul.u32 %v290_v14, %v288_v15  ;;  %v295_v34 = vshll.u32 %v292_v20, 16  ;;  %v128_v35 = vsel %vm118_vm6, %v114_v19, 1326507024  ;;  %v296_v37 = vshrl.u32 %v292_v20, 16 }
  0xa0   :  { %v313_v38 = vmul.u32 %v311_v16, %v803_v29  ;;  %v315_v39 = vmul.u32 %v311_v16, %v288_v15  ;;  %v297_v27 = vshll.u32 %v293_v24, 16  ;;  %v317_v42 = vshll.u32 %v314_v25, 16 }
  0xa1   :  { %vm299_vm7 = vc.u32 %v291_v32, %v295_v34  ;;  %v301_v40 = vadd.s32 %v295_v34, %v291_v32  ;;  %v298_v43 = vshrl.u32 %v293_v24, 16  ;;  %v316_v46 = vmul.u32 %v312_v17, %v288_v15 }
  0xa2   :  { %v300_v44 = vsel %vm299_vm7, 1, %v716_v0  ;;  %v319_v47 = vshll.u32 %v315_v39, 16  ;;  %vm321_vm9 = vc.u32 %v313_v38, %v317_v42  ;;  %v323_v49 = vadd.s32 %v317_v42, %v313_v38 }
  0xa3   :  { %v302_v48 = vadd.s32 %v300_v44, %v294_v33  ;;  %vm303_vm8 = vc.u32 %v301_v40, %v297_v27  ;;  %v322_v51 = vsel %vm321_vm9, 1, %v716_v0  ;;  %v100_v29 = vshll.u32 %v719_v36, %v816_v58 }
  0xa4   :  { %v304_v50 = vsel %vm303_vm8, 1, %v716_v0  ;;  %v101_v52 = vshrl.u32 %v721_v41, %v826_v3  ;;  %v318_v54 = vshrl.u32 %v314_v25, 16  ;;  %v324_v55 = vadd.s32 %v322_v51, %v316_v46 }
  0xa5   :  { %v306_v53 = vadd.s32 %v304_v50, %v302_v48  ;;  %vm325_vm10 = vc.u32 %v323_v49, %v319_v47  ;;  %v103_v59 = vshll.u32 %v721_v41, %v816_v58  ;;  %v104_v60 = vshrl.u32 %v722_v45, %v826_v3 }
  0xa6   :  { %v326_v56 = vsel %vm325_vm10, 1, %v716_v0  ;;  %v859_v57 = vor.u32 %v101_v52, %v100_v29  ;;  %v106_v63 = vshll.u32 %v722_v45, %v816_v58  ;;  %v107_v1 = vshrl.u32 %v717_v31, %v826_v3 }
  0xa7   :  { %v307_v61 = vadd.s32 %v306_v53, %v296_v37  ;;  %v328_v62 = vadd.s32 %v326_v56, %v324_v55  ;;  %v124_v4 = vsel %vm118_vm6, %v111_v28, 920167782  ;;  %v320_v5 = vshrl.u32 %v315_v39, 16 }
  0xa8   :  { %v871_v6 = vor.u32 %v104_v60, %v103_v59  ;;  %vm115_vm11 = vcmp.lt.s32.totalorder %v823_v2, 1  ;;  %v108_v8 = vor.u32 %v107_v1, %v106_v63  ;;  %vm117_vm12 = vcmp.lt.s32.totalorder %v823_v2, 3 }
  0xa9   :  { %v874_v41 = vadd.s32 %v307_v61, %v298_v43  ;;  %v329_v7 = vadd.s32 %v328_v62, %v318_v54  ;;  %v877_v9 = vadd.s32 %v323_v49, %v319_v47  ;;  %v129_v45 = vsel %vm117_vm12, %v111_v28, %v128_v35 }
  0xaa   :  { %v123_v31 = vsel %vm115_vm11, %v859_v57, %v871_v6  ;;  %v885_v58 = vshll.u32 %v91_v26, 8  ;;  %v331_v12 = vmul.u32 %v798_v23, %v843_v22  ;;  %vm116_vm14 = vcmp.lt.s32.totalorder %v823_v2, 2 }
  0xab   :  { %v330_v11 = vadd.s32 %v329_v7, %v320_v5  ;;  %vm333_vm13 = vc.u32 %v874_v41, %v877_v9  ;;  %v125_v14 = vsel %vm117_vm12, %v108_v8, %v124_v4  ;;  %v127_v15 = vsel %vm115_vm11, %v871_v6, %v108_v8 }
  0xac   :  { %v126_v17 = vsel %vm116_vm14, %v123_v31, %v125_v14  ;;  %v130_v18 = vsel %vm116_vm14, %v127_v15, %v129_v45  ;;  %v132_v23 = vand.u32 65535, %v885_v58  ;;  %v133_v19 = vshrl.u32 %v885_v58, 16 }
  0xad   :  { %v334_v16 = vadd.s32 1, %v330_v11  ;;  %v134_v20 = vand.u32 65535, %v130_v18  ;;  %v135_v22 = vshrl.u32 %v130_v18, 16  ;;  %v156_v24 = vand.u32 65535, %v126_v17 }
  0xae   :  { %v157_v26 = vshrl.u32 %v126_v17, 16  ;;  %v99_v60 = vshrl.u32 %v719_v36, %v826_v3  ;;  %v120_v61 = vsel %vm118_vm6, %v108_v8, 2102212464  ;;  %vm240_vm7 = vcmp.lt.s32.totalorder %v789_v10, 0 }
  0xaf   :  { %v335_v25 = vsel %vm333_vm13, %v334_v16, %v330_v11  ;;  %v137_v32 = vmul.u32 %v135_v22, %v132_v23  ;;  %v138_v33 = vmul.u32 %v134_v20, %v133_v19  ;;  %v160_v35 = vmul.u32 %v156_v24, %v133_v19 }
  0xb0   :  { %v336_v28 = vadd.s32 %v335_v25, %v331_v12  ;;  %v159_v34 = vmul.u32 %v157_v26, %v132_v23  ;;  %v136_v38 = vmul.u32 %v134_v20, %v132_v23  ;;  %v139_v27 = vmul.u32 %v135_v22, %v133_v19 }
  0xb1   :  { %v140_v39 = vshll.u32 %v137_v32, 16  ;;  %v158_v40 = vmul.u32 %v156_v24, %v132_v23  ;;  %v142_v44 = vshll.u32 %v138_v33, 16  ;;  %v164_v48 = vshll.u32 %v160_v35, 16 }
  0xb2   :  { %v337_v37 = vadd.s32 536870912, %v336_v28  ;;  %v162_v42 = vshll.u32 %v159_v34, 16  ;;  %v161_v29 = vmul.u32 %v157_v26, %v133_v19  ;;  %v141_v55 = vshrl.u32 %v137_v32, 16 }
  0xb3   :  { %vm144_vm15 = vc.u32 %v136_v38, %v140_v39  ;;  %v146_v46 = vadd.s32 %v140_v39, %v136_v38  ;;  %v143_v1 = vshrl.u32 %v138_v33, 16  ;;  %v163_v5 = vshrl.u32 %v159_v34, 16 }
  0xb4   :  { %v903_v43 = vshrl.u32 %v337_v37, 30  ;;  %v145_v47 = vsel %vm144_vm15, 1, %v716_v0  ;;  %vm166_vm0 = vc.u32 %v158_v40, %v162_v42  ;;  %v168_v49 = vadd.s32 %v162_v42, %v158_v40 }
  0xb5   :  { %v147_v51 = vadd.s32 %v145_v47, %v139_v27  ;;  %vm148_vm1 = vc.u32 %v146_v46, %v142_v44  ;;  %v167_v53 = vsel %vm166_vm0, 1, %v716_v0  ;;  %v119_v45 = vsel %vm115_vm11, %v99_v60, %v859_v57 }
  0xb6   :  { %v339_v50 = vshll.u32 %v903_v43, 30  ;;  %v149_v52 = vsel %vm148_vm1, 1, %v716_v0  ;;  %vm170_vm2 = vc.u32 %v168_v49, %v164_v48  ;;  %v169_v59 = vadd.s32 %v167_v53, %v161_v29 }
  0xb7   :  { %v151_v56 = vadd.s32 %v149_v52, %v147_v51  ;;  %v171_v62 = vsel %vm170_vm2, 1, %v716_v0  ;;  %v121_v36 = vsel %vm117_vm12, %v871_v6, %v120_v61  ;;  %v165_v8 = vshrl.u32 %v160_v35, 16 }
  0xb8   :  { %v340_v54 = vsub.s32 %v336_v28, %v339_v50  ;;  %v173_v7 = vadd.s32 %v171_v62, %v169_v59  ;;  %v172_v0 = vadd.s32 %v168_v49, %v164_v48  ;;  %v122_v15 = vsel %vm116_vm14, %v119_v45, %v121_v36 }
  0xb9   :  { %v152_v4 = vadd.s32 %v151_v56, %v141_v55  ;;  %v176_v57 = vmul.u32 %v885_v58, %v122_v15  ;;  %v332_v23 = vadd.s32 %v877_v9, %v874_v41  ;;  %vm931_vm8 = vcmp.le.f32.partialorder %v238_v13, 0.7853982 }
  0xba   :  { %vm341_vm3 = vcmp.lt.s32.totalorder %v340_v54, 0  ;;  %v342_v63 = vsub.s32 0, %v340_v54  ;;  %v174_v12 = vadd.s32 %v173_v7, %v163_v5  ;;  %v362_v46 = vsub.s32 4, %v903_v43 }
  0xbb   :  { %v153_v3 = vadd.s32 %v152_v4, %v143_v1  ;;  %vm85_vm12 = vcmp.lt.s32.totalorder %v795_v21, 0  ;;  %vm401_vm14 = vcmask 261120   ;;  %vm381_vm15 = vweird.f32 %v789_v10 }
  0xbc   :  { %v343_v31 = vsel %vm341_vm3, %v342_v63, %v340_v54  ;;  %v175_v16 = vadd.s32 %v174_v12, %v165_v8  ;;  %v363_v29 = vsel %vm240_vm7, %v362_v46, %v903_v43  ;;  %vm946_vm0 = vcmp.le.f32.partialorder %v83_v30, 0.7853982 }
  0xbd   :  { %v344_v11 = vclz %v343_v31  ;;  %vm178_vm4 = vc.u32 %v153_v3, %v172_v0  ;;  %v365_v59 = vsel %vm931_vm8, 0, %v363_v29  ;;  %v616_v29 = vld [vmem:[%s984_s4] ss:$0 sm:$0xff] }
  0xbe   :  { %v179_v17 = vadd.s32 1, %v175_v16  ;;  %v382_v7 = vadd.s32 3, %v365_v59 }
  0xbf   :  { %v579_v14 = vadd.s32 4294967294, %v344_v11 }
  0xc0   :  { %v180_v20 = vsel %vm178_vm4, %v179_v17, %v175_v16  ;;  %v383_v12 = vand.u32 3, %v382_v7  ;;  %vm226_vm4 = vweird.f32 %v795_v21  ;;  %v471_v7 = vld [vmem:[#allocation5] sm:$0xff] }
  0xc1   :  { %vm580_vm5 = vcmp.lt.s32.totalorder %v579_v14, 0  ;;  %v181_v22 = vadd.s32 %v180_v20, %v176_v57 }
  0xc2   :  { %v347_v18 = vsel %vm580_vm5, 0, %v579_v14  ;;  %vm385_vm10 = vcmp.eq.s32.totalorder %v383_v12, 0  ;;  %vm388_vm11 = vcmp.eq.s32.totalorder %v383_v12, 2  ;;  %vm384_vm13 = vcmp.lt.s32.totalorder %v383_v12, 2 }
  0xc3   :  { %v348_v6 = vsub.s32 32, %v347_v18  ;;  %v352_v19 = vsub.s32 4294967266, %v347_v18  ;;  %v349_v24 = vshll.u32 %v340_v54, %v347_v18  ;;  %v182_v28 = vadd.s32 536870912, %v181_v22 }
  0xc4   :  { %v177_v54 = vadd.s32 %v172_v0, %v153_v3 }
  0xc5   :  { %v350_v25 = vshrl.u32 %v332_v23, %v348_v6  ;;  %v353_v26 = vadd.s32 127, %v352_v19  ;;  %v925_v33 = vshrl.u32 %v182_v28, 30 }
  0xc7   :  { %v351_v2 = vor.u32 %v350_v25, %v349_v24  ;;  %v354_v32 = vshll.u32 %v353_v26, 23  ;;  %v184_v35 = vshll.u32 %v925_v33, 30  ;;  %v207_v25 = vsub.s32 4, %v925_v33 }
  0xc9   :  { %v355_v34 = vor.u32 4788187, %v354_v32  ;;  %v358_v58 = vcvt.s32.f32 %v351_v2  ;;  %v185_v38 = vsub.s32 %v181_v22, %v184_v35  ;;  %v208_v30 = vsel %vm85_vm12, %v207_v25, %v925_v33 }
  0xca   :  { %v210_v35 = vsel %vm946_vm0, 0, %v208_v30 }
  0xcb   :  { %v356_v37 = vand.u32 2147483647, %v355_v34  ;;  %vm186_vm6 = vcmp.lt.s32.totalorder %v185_v38, 0  ;;  %v187_v41 = vsub.s32 0, %v185_v38 }
  0xcd   :  { %v359_v39 = vmul.f32 %v358_v58, %v356_v37  ;;  %v188_v27 = vsel %vm186_vm6, %v187_v41, %v185_v38  ;;  %v227_v41 = vadd.s32 3, %v210_v35 }
  0xce   :  { %v189_v44 = vclz %v188_v27 }
  0xcf   :  { %v360_v9 = vxor.u32 2147483648, %v359_v39 }
  0xd0   :  { %v576_v49 = vadd.s32 4294967294, %v189_v44  ;;  %v228_v44 = vand.u32 3, %v227_v41 }
  0xd1   :  { %v361_v42 = vsel %vm240_vm7, %v360_v9, %v359_v39 }
  0xd2   :  { %v364_v47 = vsel %vm931_vm8, %v789_v10, %v361_v42  ;;  %vm577_vm9 = vcmp.lt.s32.totalorder %v576_v49, 0  ;;  %vm230_vm1 = vcmp.eq.s32.totalorder %v228_v44, 0  ;;  %vm233_vm2 = vcmp.eq.s32.totalorder %v228_v44, 2 }
  0xd3   :  { %v366_v48 = vmul.f32 %v364_v47, %v364_v47  ;;  %v192_v52 = vsel %vm577_vm9, 0, %v576_v49  ;;  %vm229_vm3 = vcmp.lt.s32.totalorder %v228_v44, 2  ;;  %vm483_vm9 = vcmask 523264  }
  0xd4   :  { %v193_v55 = vsub.s32 32, %v192_v52  ;;  %v197_v56 = vsub.s32 4294967266, %v192_v52  ;;  %v194_v63 = vshll.u32 %v185_v38, %v192_v52 }
  0xd5   :  { %v367_v50 = vmul.f32 -0.001358992, %v366_v48  ;;  %v374_v51 = vmul.f32 -0.00019511016, %v366_v48 }
  0xd6   :  { %v195_v62 = vshrl.u32 %v177_v54, %v193_v55  ;;  %v198_v1 = vadd.s32 127, %v197_v56  ;;  %v478_v54 = vld [vmem:[#allocation5 + $0x38] sm:$0xff]  ;;  %v477_v55 = vld [vmem:[#allocation5 + $0x30] sm:$0xff] }
  0xd7   :  { %v368_v13 = vadd.f32 0.041655596, %v367_v50  ;;  %v375_v53 = vadd.f32 0.008332121, %v374_v51  ;;  %593 = vmatpush.msra.mxu2 %v478_v54  ;;  %498 = vmatpush.msra.mxu1 %v478_v54 }
  0xd8   :  { %v196_v31 = vor.u32 %v195_v62, %v194_v63  ;;  %v199_v45 = vshll.u32 %v198_v1, 23  ;;  %v473_v63 = vld [vmem:[#allocation5 + $0x10] sm:$0xff] }
  0xd9   :  { %v369_v60 = vmul.f32 %v368_v13, %v366_v48  ;;  %v376_v61 = vmul.f32 %v375_v53, %v366_v48  ;;  %594 = vmatpush.msra.mxu2 %v477_v55  ;;  %499 = vmatpush.msra.mxu1 %v477_v55 }
  0xda   :  { %v200_v11 = vor.u32 4788187, %v199_v45  ;;  %v203_v14 = vcvt.s32.f32 %v196_v31 }
  0xdb   :  { %v370_v4 = vadd.f32 -0.4999988, %v369_v60  ;;  %v377_v5 = vadd.f32 -0.16666654, %v376_v61  ;;  %v475_v60 = vld [vmem:[#allocation5 + $0x20] sm:$0xff]  ;;  %v474_v61 = vld [vmem:[#allocation5 + $0x18] sm:$0xff] }
  0xdc   :  { %v201_v0 = vand.u32 2147483647, %v200_v11 }
  0xdd   :  { %v371_v43 = vmul.f32 %v370_v4, %v366_v48  ;;  %v378_v36 = vmul.f32 %v377_v5, %v366_v48  ;;  %v472_v4 = vld [vmem:[#allocation5 + $0x8] sm:$0xff] }
  0xde   :  { %v204_v17 = vmul.f32 %v203_v14, %v201_v0 }
  0xdf   :  { %v372_v8 = vadd.f32 1.0, %v371_v43  ;;  %v379_v3 = vadd.f32 1.0, %v378_v36 }
  0xe0   :  { %v205_v57 = vxor.u32 2147483648, %v204_v17 }
  0xe1   :  { %v380_v15 = vmul.f32 %v379_v3, %v364_v47  ;;  %v389_v16 = vxor.u32 2147483648, %v372_v8 }
  0xe2   :  { %v206_v22 = vsel %vm85_vm12, %v205_v57, %v204_v17 }
  0xe3   :  { %v386_v18 = vxor.u32 2147483648, %v380_v15  ;;  %v390_v6 = vsel %vm388_vm11, %v389_v16, %v380_v15  ;;  %v209_v26 = vsel %vm946_vm0, %v795_v21, %v206_v22  ;;  %v476_v21 = vld [vmem:[#allocation5 + $0x28] sm:$0xff] }
  0xe4   :  { %v211_v10 = vmul.f32 %v209_v26, %v209_v26  ;;  %595 = vmatpush.msra.mxu2 %v476_v21  ;;  %500 = vmatpush.msra.mxu1 %v476_v21 }
  0xe5   :  { %v387_v23 = vsel %vm385_vm10, %v372_v8, %v386_v18 }
  0xe6   :  { %v391_v19 = vsel %vm384_vm13, %v387_v23, %v390_v6  ;;  %v212_v28 = vmul.f32 -0.001358992, %v211_v10  ;;  %v219_v2 = vmul.f32 -0.00019511016, %v211_v10  ;;  %596 = vmatpush.msra.mxu2 %v475_v60  ;;  %501 = vmatpush.msra.mxu1 %v475_v60 }
  0xe7   :  { %v392_v24 = vsel %vm381_vm15, nan, %v391_v19 }
  0xe8   :  { %582 = vmatmul.msk.f32.vlgmr.msra.gmra.mxu3 %vm401_vm14, %v392_v24  ;;  %v213_v32 = vadd.f32 0.041655596, %v212_v28  ;;  %v220_v34 = vadd.f32 0.008332121, %v219_v2  ;;  %597 = vmatpush.msra.mxu2 %v474_v61  ;;  %v617_v28 = vld [vmem:[%s986_s6] ss:$0 sm:$0xff] }
  0xe9   :  { %502 = vmatpush.msra.mxu1 %v474_v61  ;;  %s723_s6 = smov [#allocation7]  }
  0xea   :  { %v214_v37 = vmul.f32 %v213_v32, %v211_v10  ;;  %v221_v58 = vmul.f32 %v220_v34, %v211_v10  ;;  %598 = vmatpush.msra.mxu2 %v473_v63  ;;  %s559_s19 = sshll.u32 %s723_s6, 4  ;;  %s560_s19 = int_to_ptr.vmem [resolvable:$true] %s559_s19 }
  0xeb   :  { %503 = vmatpush.msra.mxu1 %v473_v63 }
  0xec   :  { %v215_v38 = vadd.f32 -0.4999988, %v214_v37  ;;  %v222_v39 = vadd.f32 -0.16666654, %v221_v58  ;;  %599 = vmatpush.msra.mxu2 %v472_v4 }
  0xed   :  { %504 = vmatpush.msra.mxu1 %v472_v4 }
  0xee   :  { %v216_v9 = vmul.f32 %v215_v38, %v211_v10  ;;  %v223_v27 = vmul.f32 %v222_v39, %v211_v10  ;;  %600 = vmatpush.msra.mxu2 %v471_v7 }
  0xef   :  { %505 = vmatpush.msra.mxu1 %v471_v7 }
  0xf0   :  { %v217_v40 = vadd.f32 1.0, %v216_v9  ;;  %v224_v42 = vadd.f32 1.0, %v223_v27 }
  0xf2   :  { %v225_v46 = vmul.f32 %v224_v42, %v209_v26  ;;  %v234_v47 = vxor.u32 2147483648, %v217_v40 }
  0xf4   :  { %v231_v48 = vxor.u32 2147483648, %v225_v46  ;;  %v235_v49 = vsel %vm233_vm2, %v234_v47, %v225_v46 }
  0xf6   :  { %v232_v33 = vsel %vm230_vm1, %v217_v40, %v231_v48 }
  0xf7   :  { %v236_v50 = vsel %vm229_vm3, %v232_v33, %v235_v49 }
  0xf8   :  { %v237_v51 = vsel %vm226_vm4, nan, %v236_v50 }
  0xf9   :  { %581 = vmatmul.msk.f32.vlgmr.msra.gmra.mxu0 %vm401_vm14, %v237_v51 }
 0x16b   :  { %v428_v52 = vpop.f32.mrf.mxu3 }
 0x16c   :  { %v429_v13 = vadd.f32 %v616_v29, %v428_v52 }
 0x16e   :  { %v584_v53 = vmul.f32 -1.442695, %v429_v13 }
 0x170   :  { %618 = vpow2.f32 %v584_v53 }
 0x176   :  { %v619_v56 = vpop.eup %618  ;;  %v425_v62 = vpop.f32.mrf.mxu0 }
 0x177   :  { %v438_v59 = vadd.f32 1.0, %v619_v56  ;;  %v426_v1 = vadd.f32 %v616_v29, %v425_v62 }
 0x179   :  { %620 = vrcp.f32 %v438_v59  ;;  %v583_v5 = vmul.f32 -1.442695, %v426_v1  ;;  %v465_v36 = vand.u32 2147483648, %v438_v59  ;;  %v463_v8 = vand.u32 2147483647, %v438_v59 }
 0x17a   :  { %vm459_vm6 = vweird.f32 %v438_v59 }
 0x17b   :  { %622 = vpow2.f32 %v583_v5  ;;  %v466_v14 = vor.u32 1.1754944e-38, %v465_v36  ;;  %vm464_vm8 = vcmp.eq.f32.partialorder %v463_v8, 8.507059e+37 }
 0x17f   :  { %v621_v31 = vpop.eup %620 }
 0x180   :  { %v455_v45 = vmul.f32 %v621_v31, %v438_v59  ;;  %vm460_vm5 = vweird.f32 %v621_v31 }
 0x181   :  { %v623_v3 = vpop.eup %622  ;;  %vm461_vm7 = vmor %vm459_vm6, %vm460_vm5 }
 0x182   :  { %v456_v43 = vsub.f32 1.0, %v455_v45  ;;  %v437_v0 = vadd.f32 1.0, %v623_v3 }
 0x184   :  { %v457_v11 = vmul.f32 %v621_v31, %v456_v43  ;;  %624 = vrcp.f32 %v437_v0  ;;  %v450_v6 = vand.u32 2147483648, %v437_v0  ;;  %v448_v20 = vand.u32 2147483647, %v437_v0 }
 0x185   :  { %vm444_vm11 = vweird.f32 %v437_v0 }
 0x186   :  { %v458_v12 = vadd.f32 %v621_v31, %v457_v11  ;;  %v451_v24 = vor.u32 1.1754944e-38, %v450_v6  ;;  %vm449_vm13 = vcmp.eq.f32.partialorder %v448_v20, 8.507059e+37 }
 0x188   :  { %v462_v15 = vsel %vm461_vm7, %v621_v31, %v458_v12 }
 0x189   :  { %v467_v16 = vsel %vm464_vm8, %v466_v14, %v462_v15 }
 0x18a   :  { %v470_v17 = vmul.f32 %v467_v16, %v429_v13  ;;  %v625_v18 = vpop.eup %624 }
 0x18b   :  { %v440_v57 = vmul.f32 %v625_v18, %v437_v0  ;;  %vm445_vm10 = vweird.f32 %v625_v18 }
 0x18c   :  { %586 = vmatmul.msk.f32.vlgmr.msra.gmra.mxu2 %vm483_vm9, %v470_v17  ;;  %vm446_vm12 = vmor %vm444_vm11, %vm445_vm10 }
 0x18d   :  { %v441_v23 = vsub.f32 1.0, %v440_v57 }
 0x18f   :  { %v442_v19 = vmul.f32 %v625_v18, %v441_v23 }
 0x191   :  { %v443_v22 = vadd.f32 %v625_v18, %v442_v19 }
 0x193   :  { %v447_v25 = vsel %vm446_vm12, %v625_v18, %v443_v22 }
 0x194   :  { %v452_v26 = vsel %vm449_vm13, %v451_v24, %v447_v25 }
 0x195   :  { %v469_v10 = vmul.f32 %v452_v26, %v426_v1 }
 0x197   :  { %585 = vmatmul.msk.f32.vlgmr.msra.gmra.mxu1 %vm483_vm9, %v469_v10 }
 0x20f   :  { %v510_v2 = vpop.f32.mrf.mxu2 }
 0x210   :  { %v511_v30 = vadd.f32 %v617_v28, %v510_v2 }
 0x212   :  { %v588_v32 = vmul.f32 -1.442695, %v511_v30 }
 0x214   :  { %626 = vpow2.f32 %v588_v32  ;;  %v507_v34 = vpop.f32.mrf.mxu1 }
 0x215   :  { %v508_v35 = vadd.f32 %v617_v28, %v507_v34 }
 0x217   :  { %v587_v58 = vmul.f32 -1.442695, %v508_v35 }
 0x219   :  { %628 = vpow2.f32 %v587_v58 }
 0x21a   :  { %v627_v37 = vpop.eup %626 }
 0x21b   :  { %v520_v38 = vadd.f32 1.0, %v627_v37 }
 0x21d   :  { %630 = vrcp.f32 %v520_v38  ;;  %v547_v42 = vand.u32 2147483648, %v520_v38  ;;  %v545_v46 = vand.u32 2147483647, %v520_v38  ;;  %vm541_vm15 = vweird.f32 %v520_v38 }
 0x21f   :  { %v629_v39 = vpop.eup %628  ;;  %v548_v33 = vor.u32 1.1754944e-38, %v547_v42  ;;  %vm546_vm1 = vcmp.eq.f32.partialorder %v545_v46, 8.507059e+37 }
 0x220   :  { %v519_v9 = vadd.f32 1.0, %v629_v39 }
 0x222   :  { %632 = vrcp.f32 %v519_v9  ;;  %v532_v13 = vand.u32 2147483648, %v519_v9  ;;  %v530_v54 = vand.u32 2147483647, %v519_v9  ;;  %vm526_vm3 = vweird.f32 %v519_v9 }
 0x223   :  { %v631_v41 = vpop.eup %630 }
 0x224   :  { %v537_v27 = vmul.f32 %v631_v41, %v520_v38  ;;  %vm542_vm14 = vweird.f32 %v631_v41  ;;  %v533_v56 = vor.u32 1.1754944e-38, %v532_v13  ;;  %vm531_vm5 = vcmp.eq.f32.partialorder %v530_v54, 8.507059e+37 }
 0x225   :  { %vm543_vm0 = vmor %vm541_vm15, %vm542_vm14 }
 0x226   :  { %v538_v40 = vsub.f32 1.0, %v537_v27 }
 0x228   :  { %v539_v44 = vmul.f32 %v631_v41, %v538_v40  ;;  %v633_v48 = vpop.eup %632 }
 0x229   :  { %v522_v49 = vmul.f32 %v633_v48, %v519_v9  ;;  %vm527_vm2 = vweird.f32 %v633_v48 }
 0x22a   :  { %v540_v47 = vadd.f32 %v631_v41, %v539_v44  ;;  %vm528_vm4 = vmor %vm526_vm3, %vm527_vm2 }
 0x22b   :  { %v523_v29 = vsub.f32 1.0, %v522_v49 }
 0x22c   :  { %v544_v50 = vsel %vm543_vm0, %v631_v41, %v540_v47 }
 0x22d   :  { %v549_v51 = vsel %vm546_vm1, %v548_v33, %v544_v50  ;;  %v524_v53 = vmul.f32 %v633_v48, %v523_v29 }
 0x22e   :  { %v552_v52 = vmul.f32 %v549_v51, %v511_v30 }
 0x22f   :  { %v525_v55 = vadd.f32 %v633_v48, %v524_v53 }
 0x230   :  { %554 = vst.msk [vmem:[#allocation7 + $0x8] sm:$0xff] %vm483_vm9, %v552_v52 }
 0x231   :  { %v529_v21 = vsel %vm528_vm4, %v633_v48, %v525_v55 }
 0x232   :  { %v534_v59 = vsel %vm531_vm5, %v533_v56, %v529_v21 }
 0x233   :  { %v551_v60 = vmul.f32 %v534_v59, %v508_v35 }
 0x235   :  { %553 = vst.msk [vmem:[#allocation7] sm:$0xff] %vm483_vm9, %v551_v60 }
 0x236   :  { %567 = dma.vmem_to_hbm [thread:$0]  %s560_s19, 256, %s562_s22, [#allocation4], %s713_s9, %s713_s9, %s714_s10  }
 0x237   :  { %710 = dma.done.wait [#allocation4], 256  }
 0x238   :  { %711 = vsyncadd [#allocation4], 4294967040 }
 0x239   :  { %572 = vsyncpa [#allocation3], 1 }
 0x23a   :  { %573 = vsyncpa [#allocation6], 1 }
 0x23b   :  { %574 = vsyncpa [#allocation4], 1 }

</bundles_post_ra>
